<compile_context>
chip_gen: v7x
topology: tpu7x:2x2x1
jax: 0.10.0
libtpu: 0.0.40
codegen_flags: <defaults>
</compile_context>

<pallas_src>
import jax
import jax.numpy as jnp
from jax.experimental import pallas as pl
from jax.experimental.pallas import tpu as pltpu

_LANE = 128
# Cap chosen so 2-deep buffering of (in_f + out_f) f32 rows stays ~8.4 MiB,
# inside the default scoped-VMEM budget on v5e (16 MiB), v6e (32 MiB), v7x (32 MiB).
_MAX_TILE_B = 131072


def _round_up(x, m):
    return ((x + m - 1) // m) * m


def _linear_kernel(xt_ref, w_ref, b_ref, o_ref):
    # xt_ref: (in_f, TILE_B)  w_ref: (out_f, in_f)  b_ref: (out_f, 1)  o_ref: (out_f, TILE_B)
    xt = xt_ref[...].astype(jnp.float32)
    w = w_ref[...].astype(jnp.float32)
    b = b_ref[...].astype(jnp.float32)
    # (out_f, in_f) @ (in_f, TILE_B) -> (out_f, TILE_B); contraction expressed
    # directly against the lane-dense batch axis, no in-kernel transpose.
    yt = jnp.dot(w, xt, preferred_element_type=jnp.float32) + b
    o_ref[...] = yt.astype(o_ref.dtype)


def linear_feature_major_pallas(x_t, weight, bias, *, tile_b=_MAX_TILE_B):
    """y^T = W @ x^T + b for feature-major activations.

    x_t: (in_f, B), weight: (out_f, in_f), bias: (out_f,) -> y_t: (out_f, B).
    Callers that keep activations feature-major end-to-end should use this
    directly and avoid the (B, in_f) <-> (in_f, B) transpose passes.
    """
    in_f, B = x_t.shape
    out_f, in_f_w = weight.shape
    assert in_f == in_f_w

    # Lane-aligned batch tile, capped for VMEM, and (when B allows) split into
    # at least 2 tiles so the "parallel" axis feeds both v7x TensorCores.
    eff_tile = min(tile_b, max(_LANE, _round_up(pl.cdiv(B, 2), _LANE)))
    n_tiles = pl.cdiv(B, eff_tile)

    bias2d = bias.reshape(out_f, 1)

    y_t = pl.pallas_call(
        _linear_kernel,
        out_shape=jax.ShapeDtypeStruct((out_f, B), x_t.dtype),
        grid_spec=pltpu.PrefetchScalarGridSpec(
            num_scalar_prefetch=0,
            grid=(n_tiles,),
            in_specs=[
                # x^T tiles along the lane-dense batch axis; the ragged final
                # block is read partially (garbage only feeds masked-out cols).
                pl.BlockSpec((in_f, eff_tile), lambda i: (0, i)),
                # Tiny weight / bias: full arrays, constant block across the grid.
                pl.BlockSpec((out_f, in_f), lambda i: (0, 0)),
                pl.BlockSpec((out_f, 1), lambda i: (0, 0)),
            ],
            out_specs=pl.BlockSpec((out_f, eff_tile), lambda i: (0, i)),
        ),
        compiler_params=pltpu.CompilerParams(
            dimension_semantics=("parallel",),
            vmem_limit_bytes=32 * 1024 * 1024,  # headroom; safe on v5e/v6e/v7x
        ),
    )(x_t, weight, bias2d)
    return y_t


def linear_pallas(x, weight, bias, *, tile_b=_MAX_TILE_B, min_batch_for_pallas=4096):
    """y = x @ weight.T + bias, matching torch.nn.Linear(5, 3) semantics.

    x: (B, in_f), weight: (out_f, in_f), bias: (out_f,) -> (B, out_f)
    """
    B, in_f = x.shape
    out_f, in_f_w = weight.shape
    assert in_f == in_f_w

    # Tiny-B fast path: a Pallas launch + layout plumbing can't beat XLA's
    # fused GEMV at small B.  (The test below forces the kernel path.)
    if B < min_batch_for_pallas and min_batch_for_pallas > 0:
        return x @ weight.T + bias

    # TODO(synk): if the surrounding model keeps activations feature-major,
    # call linear_feature_major_pallas directly and skip both transposes.
    x_t = x.T                                             # (in_f, B)
    y_t = linear_feature_major_pallas(x_t, weight, bias, tile_b=tile_b)
    return y_t.T                                          # (B, out_f)


if __name__ == "__main__":
    key = jax.random.PRNGKey(0)
    kx, kw, kb, kx2 = jax.random.split(key, 4)

    B, IN, OUT = 8, 5, 3  # nn.Linear(5, 3); small batch
    x = jax.random.normal(kx, (B, IN), dtype=jnp.float32)

    # Deterministic parameter init (mimics nn.Linear uniform(-1/sqrt(in), 1/sqrt(in)))
    bound = 1.0 / (IN ** 0.5)
    weight = jax.random.uniform(kw, (OUT, IN), jnp.float32, -bound, bound)
    bias = jax.random.uniform(kb, (OUT,), jnp.float32, -bound, bound)

    # Force the Pallas path even at tiny B so the kernel is exercised.
    y = linear_pallas(x, weight, bias, min_batch_for_pallas=0)
    jax.block_until_ready(y)
    y_ref = x @ weight.T + bias
    assert y.shape == (B, OUT)
    assert jnp.allclose(y, y_ref, atol=1e-5, rtol=1e-5), "mismatch vs reference (B=8)"

    # Also exercise the multi-tile path with a ragged final block (still small):
    # tile selection gives 2 tiles of 256 for B=300, second block partial.
    B2 = 300
    x2 = jax.random.normal(kx2, (B2, IN), dtype=jnp.float32)
    y2 = linear_pallas(x2, weight, bias, min_batch_for_pallas=0)
    jax.block_until_ready(y2)
    y2_ref = x2 @ weight.T + bias
    assert y2.shape == (B2, OUT)
    assert jnp.allclose(y2, y2_ref, atol=1e-5, rtol=1e-5), "mismatch vs reference (B=300)"

    print("KERNEL_OK")
</pallas_src>

<mosaic_0001>
module attributes {stable_mosaic.version = 11 : i64} {
  func.func @_linear_kernel(%arg0: i32, %arg1: memref<5x128xf32, #tpu.memory_space<vmem>>, %arg2: memref<3x5xf32, #tpu.memory_space<vmem>>, %arg3: memref<3x1xf32, #tpu.memory_space<vmem>>, %arg4: memref<3x128xf32, #tpu.memory_space<vmem>>) attributes {dimension_semantics = [#tpu.dimension_semantics<parallel>], iteration_bounds = array<i64: 1>, scalar_prefetch = 0 : i64, scratch_operands = 0 : i64, tpu.core_type = #tpu.core_type<tc>, window_params = [{transform_indices = @transform_0, window_bounds = array<i64: 5, 128>}, {pipeline_mode = #tpu.pipeline_mode<synchronous>, transform_indices = @transform_1, window_bounds = array<i64: 3, 5>}, {pipeline_mode = #tpu.pipeline_mode<synchronous>, transform_indices = @transform_2, window_bounds = array<i64: 3, 1>}, {transform_indices = @transform_3, window_bounds = array<i64: 3, 128>}]} {
    %c0 = arith.constant 0 : index
    %c0_0 = arith.constant 0 : index
    %0 = vector.load %arg1[%c0, %c0_0] : memref<5x128xf32, #tpu.memory_space<vmem>>, vector<5x128xf32>
    %c0_1 = arith.constant 0 : index
    %c0_2 = arith.constant 0 : index
    %1 = vector.load %arg2[%c0_1, %c0_2] : memref<3x5xf32, #tpu.memory_space<vmem>>, vector<3x5xf32>
    %c0_3 = arith.constant 0 : index
    %c0_4 = arith.constant 0 : index
    %2 = vector.load %arg3[%c0_3, %c0_4] : memref<3x1xf32, #tpu.memory_space<vmem>>, vector<3x1xf32>
    %cst = arith.constant dense<0.000000e+00> : vector<3x128xf32>
    %3 = tpu.matmul %1, %0, %cst {dimension_numbers = #tpu.dot_dimension_numbers<[1], [0], [0], [1], [0, 0, 1, 1], [], []>} : vector<3x5xf32>, vector<5x128xf32>, vector<3x128xf32> -> vector<3x128xf32>
    %4 = vector.broadcast %2 : vector<3x1xf32> to vector<3x128xf32>
    %5 = arith.addf %3, %4 : vector<3x128xf32>
    %c0_5 = arith.constant 0 : index
    %c0_6 = arith.constant 0 : index
    %6 = vector.load %arg4[%c0_5, %c0_6] : memref<3x128xf32, #tpu.memory_space<vmem>>, vector<3x128xf32>
    tpu.vector_store %arg4[%c0_5, %c0_6], %5 {strides = array<i32>} : memref<3x128xf32, #tpu.memory_space<vmem>>, vector<3x128xf32>,
    return
  }
  func.func @transform_0(%arg0: i32) -> (i32, i32) {
    %c0_i32 = arith.constant 0 : i32
    %c0_i32_0 = arith.constant 0 : i32
    return %c0_i32, %arg0 : i32, i32
  }
  func.func @transform_1(%arg0: i32) -> (i32, i32) {
    %c0_i32 = arith.constant 0 : i32
    %c0_i32_0 = arith.constant 0 : i32
    %c0_i32_1 = arith.constant 0 : i32
    return %c0_i32, %c0_i32_0 : i32, i32
  }
  func.func @transform_2(%arg0: i32) -> (i32, i32) {
    %c0_i32 = arith.constant 0 : i32
    %c0_i32_0 = arith.constant 0 : i32
    %c0_i32_1 = arith.constant 0 : i32
    return %c0_i32, %c0_i32_0 : i32, i32
  }
  func.func @transform_3(%arg0: i32) -> (i32, i32) {
    %c0_i32 = arith.constant 0 : i32
    %c0_i32_0 = arith.constant 0 : i32
    return %c0_i32, %arg0 : i32, i32
  }
}

</mosaic_0001>

<bundles_post_ra>
// kernel: tpu_custom_call.1
= control target key start
LH: loop header
LB: loop body
LE: loop exit
PB: predicated region body
PF: predicated region fallthrough
CT: control target
= control target key end

     0   :  { %8 = vsyncpa [#allocation3], 0  ;;  %s247_s0 = inlined_call_operand.hbm [shape: f32[5,8], index: 0, kind: input, shape index: {}]   ;;  %s248_s1 = inlined_call_operand.vmem [shape: f32[3,5], index: 1, kind: input, shape index: {}]   ;;  %s249_s2 = inlined_call_operand.vmem [shape: f32[3,1], index: 2, kind: input, shape index: {}]   ;;  %s250_s3 = inlined_call_operand.hbm [shape: f32[3,8], index: 3, kind: output, shape index: {}]  }
   0x1   :  { %9 = vsyncpa [#allocation4], 0  ;;  %s192_s12 = smov [#allocation2]   ;;  %s144_s16 = scalar_lea.hbm %s247_s0, 128 }
   0x2   :  { %s16_s13 = sshll.u32 %s192_s12, 4  ;;  %p145_p0 = scmp.ne.s32.totalorder %s247_s0, %s144_s16  ;;  %s17_s13 = int_to_ptr.vmem [resolvable:$true] %s16_s13 }
   0x3   :  { %p148_p1 = scmp.lt.u32.totalorder %s144_s16, %s247_s0 }
   0x5   :  { %p150_p2 = pnand %p148_p1, %p145_p0 }
   0x7   :  { %153 = shalt.err (!%p150_p2)
}
   0x8   :  { %s154_s21 = scalar_lea.vmem %s17_s13, 128  ;;  %p159_p4 = scmp.lt.s32.totalorder %s17_s13, %s17_s13 }
   0x9   :  { %p155_p3 = scmp.ne.s32.totalorder %s17_s13, %s154_s21  ;;  %p160_p5 = scmp.lt.s32.totalorder %s154_s21, %s154_s21 }
   0xb   :  { %p161_p6 = por %p160_p5, %p159_p4 }
   0xd   :  { %p162_p7 = pnand %p161_p6, %p155_p3 }
   0xf   :  { %165 = shalt.err (!%p162_p7)
}
  0x10   :  { %19 = dma.hbm_to_vmem [thread:$0]  %s247_s0, 128, %s17_s13, [#allocation3]  }
  0x11   :  { %188 = dma.done.wait [#allocation3], 128  }
  0x12   :  { %189 = vsyncadd [#allocation3], 4294967168  ;;  %v193_v0 = vmov 0.0   ;;  %vm194_vm0 = vmmov 0   ;;  %v195_v1 = vmov 0   ;;  %vm39_vm1 = vcmask 1044480  }
  0x13   :  { %133 = vmatprep.subr.mxu0 %v193_v0  ;;  %135 = vmatprep.mubr.msk.f32.mxu0 %vm194_vm0, %v193_v0  ;;  %vm35_vm2 = vcmask 39936   ;;  %v27_v2 = vld [vmem:[#allocation2] sm:$0x1f]  ;;  %s196_s0 = smov [#allocation5]  }
  0x14   :  { %143 = vset.pattern.permute.xlu0 %v195_v1  ;;  %v28_v3 = vld [vmem:[%s248_s1] sm:$0x7]  ;;  %134 = vmatpush3.msk.msra.mxu0 %vm39_vm1, %v27_v2  ;;  %s120_s28 = sshll.u32 %s196_s0, 4  ;;  %s121_s28 = int_to_ptr.vmem [resolvable:$true] %s120_s28 }
  0x15   :  { %v29_v4 = vld [vmem:[%s249_s2] sm:$0x7]  ;;  %136 = vmatmul.mubr.msk.f32.vlgmr.msra.gmra.mrb[0].mxu0 %vm35_vm2, %v28_v3  ;;  %s166_s29 = scalar_lea.vmem %s121_s28, 64  ;;  %p171_p9 = scmp.lt.s32.totalorder %s121_s28, %s121_s28 }
  0x16   :  { %32 = vperm.xlu0 %143, %v29_v4   ;;  %p167_p8 = scmp.ne.s32.totalorder %s121_s28, %s166_s29  ;;  %p172_p10 = scmp.lt.s32.totalorder %s166_s29, %s166_s29 }
  0x18   :  { %p173_p11 = por %p172_p10, %p171_p9 }
  0x1a   :  { %p174_p12 = pnand %p173_p11, %p167_p8 }
  0x95   :  { %v33_v5 = vpop.permute.xlu0 %32 }
  0xe8   :  { %v109_v6 = vpop.f32.mrb[0].mxu0 }
  0xe9   :  { %v110_v7 = vadd.f32 %v109_v6, %v33_v5  ;;  %v137_v8 = vpop.f32.mrb[1].mxu0 }
  0xeb   :  { %113 = vst [vmem:[#allocation5] sm:$0x7] %v110_v7 }
  0xec   :  { %177 = shalt.err (!%p174_p12)
}
  0xed   :  { %s178_s30 = scalar_lea.hbm %s250_s3, 64 }
  0xee   :  { %p179_p13 = scmp.ne.s32.totalorder %s250_s3, %s178_s30  ;;  %p182_p0 = scmp.lt.u32.totalorder %s178_s30, %s250_s3 }
  0xf0   :  { %p184_p1 = pnand %p182_p0, %p179_p13 }
  0xf2   :  { %187 = shalt.err (!%p184_p1)
}
  0xf3   :  { %123 = dma.vmem_to_hbm [thread:$0]  %s121_s28, 64, %s250_s3, [#allocation4]  }
  0xf4   :  { %190 = dma.done.wait [#allocation4], 64  }
  0xf5   :  { %191 = vsyncadd [#allocation4], 4294967232 }
  0xf6   :  { %127 = vsyncpa [#allocation3], 1 }
  0xf7   :  { %128 = vsyncpa [#allocation4], 1 }

</bundles_post_ra>
